<compile_context>
chip_gen: v5e
topology: v5e:2x2
jax: 0.10.0
libtpu: 0.0.40
codegen_flags: <defaults>
</compile_context>

<pallas_src>
import jax
import jax.numpy as jnp
from jax.experimental import pallas as pl
from jax.experimental.pallas import tpu as pltpu

LN_EPS = 1e-12           # BERT LayerNorm eps
_TM_CAP = 512            # max rows per tile (multiple of 16 for bf16 sublane packing)
_TN_CAP = 1024           # max vocab cols per tile (multiple of 128, lane-dense stores)

_SQRT_HALF = 0.7071067811865476


def _gelu_exact(x):
    # HF/fairseq BERT "gelu" is the exact erf form.
    return 0.5 * x * (1.0 + jax.lax.erf(x * _SQRT_HALF))


def _cdiv(a, b):
    return (a + b - 1) // b


def _round_up(a, b):
    return _cdiv(a, b) * b


def _mlm_head_kernel(x_ref, w1_ref, b1_ref, g_ref, beta_ref,
                     w2_ref, bias_ref, o_ref, h_ref):
    """grid = (vocab_split, row_tiles, vocab_tiles_per_split); axis 2 is sequential."""
    j = pl.program_id(2)

    @pl.when(j == 0)
    def _():
        # BertPredictionHeadTransform, computed once per (split, row-tile).
        # bf16 operands -> single-pass MXU with f32 accumulation.
        h = jnp.dot(x_ref[...], w1_ref[...], preferred_element_type=jnp.float32)
        h = h + b1_ref[...]
        h = _gelu_exact(h)
        mu = jnp.mean(h, axis=-1, keepdims=True)
        var = jnp.mean(jnp.square(h - mu), axis=-1, keepdims=True)
        h = (h - mu) * jax.lax.rsqrt(var + LN_EPS)
        h = h * g_ref[...] + beta_ref[...]
        h_ref[...] = h.astype(h_ref.dtype)          # bf16 scratch feeds the MXU directly

    # Decoder tile: (TM, H) @ (H, TN) + bias tile -> lane-dense (TM, TN) output.
    logits = jnp.dot(h_ref[...], w2_ref[...], preferred_element_type=jnp.float32)
    o_ref[...] = (logits + bias_ref[...]).astype(o_ref.dtype)


def _vmem_estimate_bytes(TM, TN, H):
    bf16, f32, dbl = 2, 4, 2
    est = dbl * TM * H * bf16           # x row tile
    est += dbl * H * H * bf16           # dense weight (resident)
    est += dbl * 3 * H * f32            # dense bias / LN gamma / LN beta
    est += dbl * H * TN * bf16          # decoder weight tile
    est += dbl * TN * f32               # decoder bias tile
    est += dbl * TM * TN * f32          # output tile
    est += TM * H * bf16                # persistent hidden scratch
    return est


def mlm_head_forward(x, w_dense, b_dense, ln_gamma, ln_beta, w_decoder, decoder_bias):
    """
    Args (weights stored in "matmul" layout, i.e. transposed vs. torch nn.Linear):
        x:            [..., H]
        w_dense:      [H, H]   so that h = x @ w_dense + b_dense
        b_dense:      [H]
        ln_gamma:     [H]      LayerNorm weight
        ln_beta:      [H]      LayerNorm bias
        w_decoder:    [H, V]   so that logits = h @ w_decoder + decoder_bias
        decoder_bias: [V]      (the module's self.bias; decoder itself is bias-free)
    Returns:
        logits [..., V] in x.dtype
    """
    orig_shape = x.shape
    H = orig_shape[-1]
    V = w_decoder.shape[-1]
    x2d = x.reshape(-1, H)
    M = x2d.shape[0]

    # ---- Row tiling: pad M to a multiple of 16, minimize tile count then padding. ----
    m_pad_u = _round_up(M, 16)
    n_row_tiles = _cdiv(m_pad_u, _TM_CAP)
    TM = _round_up(_cdiv(m_pad_u, n_row_tiles), 16)
    M_pad = n_row_tiles * TM

    # ---- Vocab tiling: lane-dense multiples of 128, capped at _TN_CAP. ----
    v_pad_u = _round_up(V, 128)
    n_voc_tiles = _cdiv(v_pad_u, _TN_CAP)
    TN = _round_up(_cdiv(v_pad_u, n_voc_tiles), 128)

    # When there is only one row tile, split the vocab range across v7x's 2 TensorCores.
    nsplit = 2 if (n_row_tiles == 1 and n_voc_tiles >= 2) else 1
    if n_voc_tiles % nsplit:
        n_voc_tiles += 1
    V_pad = n_voc_tiles * TN
    ntv_local = n_voc_tiles // nsplit

    # ---- Operand prep: bf16 matmul operands, f32 vectors, zero padding. ----
    xb = x2d.astype(jnp.bfloat16)
    if M_pad != M:
        xb = jnp.pad(xb, ((0, M_pad - M), (0, 0)))
    w1b = w_dense.astype(jnp.bfloat16)
    w2b = w_decoder.astype(jnp.bfloat16)
    biasf = decoder_bias.astype(jnp.float32)
    if V_pad != V:
        w2b = jnp.pad(w2b, ((0, 0), (0, V_pad - V)))
        biasf = jnp.pad(biasf, ((0, V_pad - V),))
    b1_2d = b_dense.reshape(1, H).astype(jnp.float32)
    g_2d = ln_gamma.reshape(1, H).astype(jnp.float32)
    beta_2d = ln_beta.reshape(1, H).astype(jnp.float32)
    bias_2d = biasf.reshape(1, V_pad)

    grid = (nsplit, M_pad // TM, ntv_local)

    est = _vmem_estimate_bytes(TM, TN, H)
    vmem_limit = int(max(32 * 1024 * 1024, min(64 * 1024 * 1024, 2 * est)))

    # TODO(synk): on v5e, if profiling shows exposed DMA in the decoder loop, add
    # pipeline_mode=pl.Buffered(3) to the w_decoder BlockSpec.
    out = pl.pallas_call(
        _mlm_head_kernel,
        out_shape=jax.ShapeDtypeStruct((M_pad, V_pad), x.dtype),
        grid=grid,
        in_specs=[
            pl.BlockSpec((TM, H), lambda s, i, j: (i, 0)),     # x row tile (reused over j)
            pl.BlockSpec((H, H), lambda s, i, j: (0, 0)),      # dense weight (resident, bf16)
            pl.BlockSpec((1, H), lambda s, i, j: (0, 0)),      # dense bias (f32)
            pl.BlockSpec((1, H), lambda s, i, j: (0, 0)),      # LN gamma (f32)
            pl.BlockSpec((1, H), lambda s, i, j: (0, 0)),      # LN beta (f32)
            pl.BlockSpec((H, TN), lambda s, i, j: (0, s * ntv_local + j)),   # decoder weight tile
            pl.BlockSpec((1, TN), lambda s, i, j: (0, s * ntv_local + j)),   # decoder bias tile
        ],
        out_specs=pl.BlockSpec((TM, TN), lambda s, i, j: (i, s * ntv_local + j)),
        scratch_shapes=[pltpu.VMEM((TM, H), jnp.bfloat16)],    # transformed hidden tile
        compiler_params=pltpu.CompilerParams(
            # Vocab axis must stay sequential ("arbitrary") so the j==0 scratch write
            # precedes every decoder tile of that row tile.
            dimension_semantics=("parallel", "parallel", "arbitrary"),
            vmem_limit_bytes=vmem_limit,
        ),
    )(xb, w1b, b1_2d, g_2d, beta_2d, w2b, bias_2d)

    out = out[:M, :V]
    return out.reshape(*orig_shape[:-1], V)


if __name__ == "__main__":
    batch, seq, hidden, vocab = 2, 8, 32, 1024

    key = jax.random.PRNGKey(0)
    kx, kw1, kb1, kg, kb, kw2 = jax.random.split(key, 6)

    x = jax.random.normal(kx, (batch, seq, hidden), dtype=jnp.float32)
    w_dense = jax.random.normal(kw1, (hidden, hidden), dtype=jnp.float32) / jnp.sqrt(hidden)
    b_dense = 0.02 * jax.random.normal(kb1, (hidden,), dtype=jnp.float32)
    ln_gamma = 1.0 + 0.1 * jax.random.normal(kg, (hidden,), dtype=jnp.float32)
    ln_beta = 0.02 * jax.random.normal(kb, (hidden,), dtype=jnp.float32)
    w_decoder = jax.random.normal(kw2, (hidden, vocab), dtype=jnp.float32) / jnp.sqrt(hidden)
    decoder_bias = jnp.zeros((vocab,), dtype=jnp.float32)   # nn.Parameter(torch.zeros(vocab))

    out = mlm_head_forward(x, w_dense, b_dense, ln_gamma, ln_beta,
                           w_decoder, decoder_bias)
    out = jax.block_until_ready(out)
    assert out.shape == (batch, seq, vocab)

    # Pure-JAX reference with the same bf16 operand rounding as the kernel
    # (f32 accumulation), so only reduction-order noise remains.
    f32 = jnp.float32
    HI = jax.lax.Precision.HIGHEST
    xb = x.astype(jnp.bfloat16).astype(f32)
    w1b = w_dense.astype(jnp.bfloat16).astype(f32)
    w2b = w_decoder.astype(jnp.bfloat16).astype(f32)
    h = jnp.einsum("bsh,hk->bsk", xb, w1b, precision=HI) + b_dense
    h = _gelu_exact(h)
    mu = jnp.mean(h, axis=-1, keepdims=True)
    var = jnp.mean(jnp.square(h - mu), axis=-1, keepdims=True)
    h = (h - mu) * jax.lax.rsqrt(var + LN_EPS)
    h = h * ln_gamma + ln_beta
    h = h.astype(jnp.bfloat16).astype(f32)
    ref = jnp.einsum("bsh,hv->bsv", h, w2b, precision=HI) + decoder_bias

    max_err = float(jnp.max(jnp.abs(out - ref)))
    assert jnp.allclose(out, ref, atol=1e-2, rtol=1e-2), f"mismatch vs reference: {max_err}"

    print("KERNEL_OK")
</pallas_src>

<mosaic_0001>
module attributes {stable_mosaic.version = 11 : i64} {
  func.func @_mlm_head_kernel(%arg0: i32, %arg1: i32, %arg2: i32, %arg3: memref<16x32xbf16, #tpu.memory_space<vmem>>, %arg4: memref<32x32xbf16, #tpu.memory_space<vmem>>, %arg5: memref<1x32xf32, #tpu.memory_space<vmem>>, %arg6: memref<1x32xf32, #tpu.memory_space<vmem>>, %arg7: memref<1x32xf32, #tpu.memory_space<vmem>>, %arg8: memref<32x1024xbf16, #tpu.memory_space<vmem>>, %arg9: memref<1x1024xf32, #tpu.memory_space<vmem>>, %arg10: memref<16x1024xf32, #tpu.memory_space<vmem>>, %arg11: memref<16x32xbf16, #tpu.memory_space<vmem>>) attributes {dimension_semantics = [#tpu.dimension_semantics<parallel>, #tpu.dimension_semantics<parallel>, #tpu.dimension_semantics<arbitrary>], iteration_bounds = array<i64: 1, 1, 1>, scalar_prefetch = 0 : i64, scratch_operands = 1 : i64, tpu.core_type = #tpu.core_type<tc>, window_params = [{transform_indices = @transform_0, window_bounds = array<i64: 16, 32>}, {pipeline_mode = #tpu.pipeline_mode<synchronous>, transform_indices = @transform_1, window_bounds = array<i64: 32, 32>}, {pipeline_mode = #tpu.pipeline_mode<synchronous>, transform_indices = @transform_2, window_bounds = array<i64: 1, 32>}, {pipeline_mode = #tpu.pipeline_mode<synchronous>, transform_indices = @transform_3, window_bounds = array<i64: 1, 32>}, {pipeline_mode = #tpu.pipeline_mode<synchronous>, transform_indices = @transform_4, window_bounds = array<i64: 1, 32>}, {transform_indices = @transform_5, window_bounds = array<i64: 32, 1024>}, {transform_indices = @transform_6, window_bounds = array<i64: 1, 1024>}, {transform_indices = @transform_7, window_bounds = array<i64: 16, 1024>}]} {
    %c0_i32 = arith.constant 0 : i32
    %0 = arith.cmpi eq, %arg2, %c0_i32 : i32
    %1 = arith.extui %0 : i1 to i32
    %c0_i32_0 = arith.constant 0 : i32
    %2 = arith.cmpi ne, %1, %c0_i32_0 : i32
    scf.if %2 {
      %c0_8 = arith.constant 0 : index
      %c0_9 = arith.constant 0 : index
      %10 = vector.load %arg3[%c0_8, %c0_9] : memref<16x32xbf16, #tpu.memory_space<vmem>>, vector<16x32xbf16>
      %c0_10 = arith.constant 0 : index
      %c0_11 = arith.constant 0 : index
      %11 = vector.load %arg4[%c0_10, %c0_11] : memref<32x32xbf16, #tpu.memory_space<vmem>>, vector<32x32xbf16>
      %cst_12 = arith.constant dense<0.000000e+00> : vector<16x32xf32>
      %12 = tpu.matmul %10, %11, %cst_12 {dimension_numbers = #tpu.dot_dimension_numbers<[1], [0], [0], [1], [0, 0, 1, 1], [], []>} : vector<16x32xbf16>, vector<32x32xbf16>, vector<16x32xf32> -> vector<16x32xf32>
      %c0_13 = arith.constant 0 : index
      %c0_14 = arith.constant 0 : index
      %13 = vector.load %arg5[%c0_13, %c0_14] : memref<1x32xf32, #tpu.memory_space<vmem>>, vector<1x32xf32>
      %14 = vector.broadcast %13 : vector<1x32xf32> to vector<16x32xf32>
      %15 = arith.addf %12, %14 : vector<16x32xf32>
      %cst_15 = arith.constant 5.000000e-01 : f32
      %16 = vector.broadcast %cst_15 : f32 to vector<16x32xf32>
      %17 = arith.mulf %16, %15 : vector<16x32xf32>
      %cst_16 = arith.constant 0.707106769 : f32
      %18 = vector.broadcast %cst_16 : f32 to vector<16x32xf32>
      %19 = arith.mulf %15, %18 : vector<16x32xf32>
      %20 = math.erf %19 : vector<16x32xf32>
      %cst_17 = arith.constant 1.000000e+00 : f32
      %21 = vector.broadcast %cst_17 : f32 to vector<16x32xf32>
      %22 = arith.addf %21, %20 : vector<16x32xf32>
      %23 = arith.mulf %17, %22 : vector<16x32xf32>
      %cst_18 = arith.constant dense<0.000000e+00> : vector<16xf32>
      %24 = vector.multi_reduction <add>, %23, %cst_18 [1] : vector<16x32xf32> to vector<16xf32>
      %25 = vector.shape_cast %24 : vector<16xf32> to vector<16x1xf32>
      %cst_19 = arith.constant 3.200000e+01 : f32
      %26 = vector.broadcast %cst_19 : f32 to vector<16x1xf32>
      %27 = arith.divf %25, %26 : vector<16x1xf32>
      %28 = vector.broadcast %27 : vector<16x1xf32> to vector<16x32xf32>
      %29 = arith.subf %23, %28 : vector<16x32xf32>
      %30 = arith.mulf %29, %29 : vector<16x32xf32>
      %cst_20 = arith.constant dense<0.000000e+00> : vector<16xf32>
      %31 = vector.multi_reduction <add>, %30, %cst_20 [1] : vector<16x32xf32> to vector<16xf32>
      %32 = vector.shape_cast %31 : vector<16xf32> to vector<16x1xf32>
      %cst_21 = arith.constant 3.200000e+01 : f32
      %33 = vector.broadcast %cst_21 : f32 to vector<16x1xf32>
      %34 = arith.divf %32, %33 : vector<16x1xf32>
      %35 = vector.broadcast %27 : vector<16x1xf32> to vector<16x32xf32>
      %36 = arith.subf %23, %35 : vector<16x32xf32>
      %cst_22 = arith.constant 9.99999996E-13 : f32
      %37 = vector.broadcast %cst_22 : f32 to vector<16x1xf32>
      %38 = arith.addf %34, %37 : vector<16x1xf32>
      %39 = math.rsqrt %38 : vector<16x1xf32>
      %40 = vector.broadcast %39 : vector<16x1xf32> to vector<16x32xf32>
      %41 = arith.mulf %36, %40 : vector<16x32xf32>
      %c0_23 = arith.constant 0 : index
      %c0_24 = arith.constant 0 : index
      %42 = vector.load %arg6[%c0_23, %c0_24] : memref<1x32xf32, #tpu.memory_space<vmem>>, vector<1x32xf32>
      %43 = vector.broadcast %42 : vector<1x32xf32> to vector<16x32xf32>
      %44 = arith.mulf %41, %43 : vector<16x32xf32>
      %c0_25 = arith.constant 0 : index
      %c0_26 = arith.constant 0 : index
      %45 = vector.load %arg7[%c0_25, %c0_26] : memref<1x32xf32, #tpu.memory_space<vmem>>, vector<1x32xf32>
      %46 = vector.broadcast %45 : vector<1x32xf32> to vector<16x32xf32>
      %47 = arith.addf %44, %46 : vector<16x32xf32>
      %48 = arith.truncf %47 : vector<16x32xf32> to vector<16x32xbf16>
      %c0_27 = arith.constant 0 : index
      %c0_28 = arith.constant 0 : index
      %49 = vector.load %arg11[%c0_27, %c0_28] : memref<16x32xbf16, #tpu.memory_space<vmem>>, vector<16x32xbf16>
      tpu.vector_store %arg11[%c0_27, %c0_28], %48 {strides = array<i32>} : memref<16x32xbf16, #tpu.memory_space<vmem>>, vector<16x32xbf16>,
    } else {
    }
    %c0 = arith.constant 0 : index
    %c0_1 = arith.constant 0 : index
    %3 = vector.load %arg11[%c0, %c0_1] : memref<16x32xbf16, #tpu.memory_space<vmem>>, vector<16x32xbf16>
    %c0_2 = arith.constant 0 : index
    %c0_3 = arith.constant 0 : index
    %4 = vector.load %arg8[%c0_2, %c0_3] : memref<32x1024xbf16, #tpu.memory_space<vmem>>, vector<32x1024xbf16>
    %cst = arith.constant dense<0.000000e+00> : vector<16x1024xf32>
    %5 = tpu.matmul %3, %4, %cst {dimension_numbers = #tpu.dot_dimension_numbers<[1], [0], [0], [1], [0, 0, 1, 1], [], []>} : vector<16x32xbf16>, vector<32x1024xbf16>, vector<16x1024xf32> -> vector<16x1024xf32>
    %c0_4 = arith.constant 0 : index
    %c0_5 = arith.constant 0 : index
    %6 = vector.load %arg9[%c0_4, %c0_5] : memref<1x1024xf32, #tpu.memory_space<vmem>>, vector<1x1024xf32>
    %7 = vector.broadcast %6 : vector<1x1024xf32> to vector<16x1024xf32>
    %8 = arith.addf %5, %7 : vector<16x1024xf32>
    %c0_6 = arith.constant 0 : index
    %c0_7 = arith.constant 0 : index
    %9 = vector.load %arg10[%c0_6, %c0_7] : memref<16x1024xf32, #tpu.memory_space<vmem>>, vector<16x1024xf32>
    tpu.vector_store %arg10[%c0_6, %c0_7], %8 {strides = array<i32>} : memref<16x1024xf32, #tpu.memory_space<vmem>>, vector<16x1024xf32>,
    return
  }
  func.func @transform_0(%arg0: i32, %arg1: i32, %arg2: i32) -> (i32, i32) {
    %c0_i32 = arith.constant 0 : i32
    %c0_i32_0 = arith.constant 0 : i32
    return %arg1, %c0_i32 : i32, i32
  }
  func.func @transform_1(%arg0: i32, %arg1: i32, %arg2: i32) -> (i32, i32) {
    %c0_i32 = arith.constant 0 : i32
    %c0_i32_0 = arith.constant 0 : i32
    %c0_i32_1 = arith.constant 0 : i32
    return %c0_i32, %c0_i32_0 : i32, i32
  }
  func.func @transform_2(%arg0: i32, %arg1: i32, %arg2: i32) -> (i32, i32) {
    %c0_i32 = arith.constant 0 : i32
    %c0_i32_0 = arith.constant 0 : i32
    %c0_i32_1 = arith.constant 0 : i32
    return %c0_i32, %c0_i32_0 : i32, i32
  }
  func.func @transform_3(%arg0: i32, %arg1: i32, %arg2: i32) -> (i32, i32) {
    %c0_i32 = arith.constant 0 : i32
    %c0_i32_0 = arith.constant 0 : i32
    %c0_i32_1 = arith.constant 0 : i32
    return %c0_i32, %c0_i32_0 : i32, i32
  }
  func.func @transform_4(%arg0: i32, %arg1: i32, %arg2: i32) -> (i32, i32) {
    %c0_i32 = arith.constant 0 : i32
    %c0_i32_0 = arith.constant 0 : i32
    %c0_i32_1 = arith.constant 0 : i32
    return %c0_i32, %c0_i32_0 : i32, i32
  }
  func.func @transform_5(%arg0: i32, %arg1: i32, %arg2: i32) -> (i32, i32) {
    %c1_i32 = arith.constant 1 : i32
    %0 = arith.muli %arg0, %c1_i32 : i32
    %1 = arith.addi %0, %arg2 : i32
    %c0_i32 = arith.constant 0 : i32
    %c0_i32_0 = arith.constant 0 : i32
    return %c0_i32, %1 : i32, i32
  }
  func.func @transform_6(%arg0: i32, %arg1: i32, %arg2: i32) -> (i32, i32) {
    %c1_i32 = arith.constant 1 : i32
    %0 = arith.muli %arg0, %c1_i32 : i32
    %1 = arith.addi %0, %arg2 : i32
    %c0_i32 = arith.constant 0 : i32
    %c0_i32_0 = arith.constant 0 : i32
    return %c0_i32, %1 : i32, i32
  }
  func.func @transform_7(%arg0: i32, %arg1: i32, %arg2: i32) -> (i32, i32) {
    %c1_i32 = arith.constant 1 : i32
    %0 = arith.muli %arg0, %c1_i32 : i32
    %1 = arith.addi %0, %arg2 : i32
    %c0_i32 = arith.constant 0 : i32
    return %arg1, %1 : i32, i32
  }
}

</mosaic_0001>

<bundles_post_ra>
// kernel: tpu_custom_call.1
= control target key start
LH: loop header
LB: loop body
LE: loop exit
PB: predicated region body
PF: predicated region fallthrough
CT: control target
= control target key end

     0   :  { %12 = vsyncpa [#allocation4], 0  ;;  %s975_s0 = inlined_call_operand.hbm [shape: bf16[16,32], index: 0, kind: input, shape index: {}]   ;;  %s976_s1 = inlined_call_operand.hbm [shape: bf16[32,32], index: 1, kind: input, shape index: {}]   ;;  %s977_s2 = inlined_call_operand.vmem [shape: f32[1,32], index: 2, kind: input, shape index: {}]   ;;  %s978_s3 = inlined_call_operand.vmem [shape: f32[1,32], index: 3, kind: input, shape index: {}]   ;;  %s979_s4 = inlined_call_operand.vmem [shape: f32[1,32], index: 4, kind: input, shape index: {}]   ;;  %s980_s5 = inlined_call_operand.hbm [shape: bf16[32,1024], index: 5, kind: input, shape index: {}]   ;;  %s981_s6 = inlined_call_operand.hbm [shape: f32[1,1024], index: 6, kind: input, shape index: {}]   ;;  %s982_s7 = inlined_call_operand.hbm [shape: f32[16,1024], index: 7, kind: output, shape index: {}]  }
   0x1   :  { %13 = vsyncpa [#allocation7], 0 }
   0x2   :  { %14 = vsyncpa [#allocation10], 0 }
   0x3   :  { %15 = vsyncpa [#allocation5], 0  ;;  %s33_s26 = sshll.u32 %s976_s1, 4  ;;  %s848_s27 = smov [#allocation6]   ;;  %s34_s26 = int_to_ptr.hbm [resolvable:$true] %s33_s26 }
   0x4   :  { %s35_s28 = sshll.u32 %s848_s27, 4  ;;  %s20_s8 = sshll.u32 %s975_s0, 4  ;;  %s36_s28 = int_to_ptr.vmem [resolvable:$true] %s35_s28  ;;  %s21_s8 = int_to_ptr.hbm [resolvable:$true] %s20_s8 }
   0x5   :  { %s849_s9 = smov 64   ;;  %s850_s10 = smov 4  }
   0x6   :  { %41 = dma.hbm_to_vmem [thread:$0]  %s34_s26, 256, %s36_s28, [#allocation7], %s849_s9, %s849_s9, %s850_s10  }
   0x7   :  { %s851_s11 = smov [#allocation3]   ;;  %s56_s1 = sshll.u32 %s980_s5, 4  ;;  %s57_s1 = int_to_ptr.hbm [resolvable:$true] %s56_s1 }
   0x8   :  { %s22_s12 = sshll.u32 %s851_s11, 4  ;;  %s852_s15 = smov [#allocation8]   ;;  %s23_s12 = int_to_ptr.vmem [resolvable:$true] %s22_s12 }
   0x9   :  { %28 = dma.hbm_to_vmem [thread:$0]  %s21_s8, 128, %s23_s12, [#allocation4], %s849_s9, %s849_s9, %s850_s10  }
   0xa   :  { %s58_s16 = sshll.u32 %s852_s15, 4  ;;  %s73_s18 = sshll.u32 %s981_s6, 4  ;;  %s59_s16 = int_to_ptr.vmem [resolvable:$true] %s58_s16  ;;  %s74_s18 = int_to_ptr.hbm [resolvable:$true] %s73_s18 }
   0xb   :  { %s853_s19 = smov 512   ;;  %s854_s20 = smov 32  }
   0xc   :  { %64 = dma.hbm_to_vmem [thread:$0]  %s57_s1, 2048, %s59_s16, [#allocation7], %s853_s19, %s853_s19, %s854_s20  }
   0xd   :  { %s855_s21 = smov [#allocation9]  }
   0xe   :  { %s75_s22 = sshll.u32 %s855_s21, 4  ;;  %s76_s22 = int_to_ptr.vmem [resolvable:$true] %s75_s22 }
   0xf   :  { %78 = dma.hbm_to_vmem [thread:$0]  %s74_s18, 128, %s76_s22, [#allocation10]  }
  0x10   :  { %840 = dma.done.wait [#allocation4], 128  }
  0x11   :  { %841 = vsyncadd [#allocation4], 4294967168 }
  0x12   :  { %842 = dma.done.wait [#allocation7], 2304  }
  0x13   :  { %843 = vsyncadd [#allocation7], 4294964992 }
  0x14   :  { %844 = dma.done.wait [#allocation10], 128  }
  0x15   :  { %845 = vsyncadd [#allocation10], 4294967168  ;;  %v678_v0 = vld [vmem:[#allocation6 + $0x8] sm:$0xff]  ;;  %v677_v1 = vld [vmem:[#allocation6] sm:$0xff]  ;;  %vm133_vm0 = vcmask 261120   ;;  %vm304_vm14 = vcmask 257024  }
  0x16   :  { %143 = vmatpush.bf16.msra.mxu0 %v678_v0  ;;  %v676_v2 = vld [vmem:[#allocation3] sm:$0xff]  ;;  %v707_v3 = vld [vmem:[%s977_s2] ss:$0 sm:$0xff]  ;;  %s570_s28 = sshll.u32 %s982_s7, 4  ;;  %s858_s29 = smov 1024   ;;  %s571_s28 = int_to_ptr.hbm [resolvable:$true] %s570_s28 }
  0x1a   :  { %144 = vmatpush.bf16.msra.mxu0 %v677_v1 }
  0x1d   :  { %597 = vmatmul.msk.bf16.vlgmr.msra.gmra.mxu0 %vm133_vm0, %v676_v2 }
  0x9a   :  { %v146_v4 = vpop.f32.mrf.mxu0 }
  0x9b   :  { %v919_v5 = vadd.f32 %v707_v3, %v146_v4 }
  0x9d   :  { %v153_v6 = vmul.f32 0.70710677, %v919_v5 }
  0x9f   :  { %v155_v7 = vmul.f32 %v153_v6, %v153_v6 }
  0xa1   :  { %v156_v8 = vmin.f32 %v155_v7, 16.0 }
  0xa2   :  { %v148_v9 = vpop.f32.mrf.mxu0 }
  0xa3   :  { %v157_v10 = vmul.f32 2.1237322e-06, %v156_v8  ;;  %v922_v11 = vadd.f32 %v707_v3, %v148_v9  ;;  %v168_v12 = vmul.f32 3.8918573e-05, %v156_v8 }
  0xa5   :  { %v158_v13 = vadd.f32 0.00028619796, %v157_v10  ;;  %v925_v14 = vmul.f32 0.70710677, %v922_v11  ;;  %v169_v15 = vadd.f32 0.001143296, %v168_v12 }
  0xa7   :  { %v159_v16 = vmul.f32 %v158_v13, %v156_v8  ;;  %v195_v17 = vmul.f32 %v925_v14, %v925_v14  ;;  %v170_v18 = vmul.f32 %v169_v15, %v156_v8  ;;  %v151_v13 = vmul.f32 0.5, %v919_v5 }
  0xa9   :  { %v196_v19 = vmin.f32 %v195_v17, 16.0  ;;  %v171_v20 = vadd.f32 0.014752088, %v170_v18  ;;  %v160_v21 = vadd.f32 0.0036580483, %v159_v16 }
  0xab   :  { %v197_v22 = vmul.f32 2.1237322e-06, %v196_v19  ;;  %v208_v23 = vmul.f32 3.8918573e-05, %v196_v19  ;;  %v172_v24 = vmul.f32 %v171_v20, %v156_v8  ;;  %v161_v28 = vmul.f32 %v160_v21, %v156_v8 }
  0xad   :  { %v198_v25 = vadd.f32 0.00028619796, %v197_v22  ;;  %v209_v26 = vadd.f32 0.001143296, %v208_v23  ;;  %v173_v27 = vadd.f32 0.112945676, %v172_v24 }
  0xae   :  { %v162_v35 = vadd.f32 0.05243302, %v161_v28  ;;  %v152_v23 = vmul.f32 0.5, %v922_v11 }
  0xaf   :  { %v199_v29 = vmul.f32 %v198_v25, %v196_v19  ;;  %v210_v30 = vmul.f32 %v209_v26, %v196_v19  ;;  %v174_v31 = vmul.f32 %v173_v27, %v156_v8  ;;  %v856_v26 = vmov 32.0  }
  0xb0   :  { %v163_v41 = vmul.f32 %v162_v35, %v156_v8 }
  0xb1   :  { %v211_v32 = vadd.f32 0.014752088, %v210_v30  ;;  %v200_v33 = vadd.f32 0.0036580483, %v199_v29  ;;  %v175_v34 = vadd.f32 0.4994258, %v174_v31 }
  0xb2   :  { %v164_v45 = vadd.f32 0.18741608, %v163_v41 }
  0xb3   :  { %v212_v36 = vmul.f32 %v211_v32, %v196_v19  ;;  %v176_v37 = vmul.f32 %v175_v34, %v156_v8  ;;  %v201_v39 = vmul.f32 %v200_v33, %v196_v19 }
  0xb4   :  { %v165_v50 = vmul.f32 %v164_v45, %v156_v8  ;;  %v648_v45 = vld [vmem:[#allocation8 + $0x68] sm:$0xf0] }
  0xb5   :  { %v213_v38 = vadd.f32 0.112945676, %v212_v36  ;;  %v177_v40 = vadd.f32 1.0, %v176_v37  ;;  %v202_v44 = vadd.f32 0.05243302, %v201_v39 }
  0xb6   :  { %v166_v55 = vadd.f32 1.1283791, %v165_v50  ;;  %v640_v50 = vld [vmem:[#allocation8 + $0x60] sm:$0xf0] }
  0xb7   :  { %v214_v42 = vmul.f32 %v213_v38, %v196_v19  ;;  %710 = vrcp.f32 %v177_v40  ;;  %v203_v49 = vmul.f32 %v202_v44, %v196_v19  ;;  %v189_v54 = vand.u32 2147483648, %v177_v40  ;;  %v689_v44 = vld [vmem:[#allocation8 + $0x4c] sm:$0xf] }
  0xb8   :  { %v187_v57 = vand.u32 2147483647, %v177_v40  ;;  %vm183_vm2 = vweird.f32 %v177_v40  ;;  %v167_v63 = vmul.f32 %v166_v55, %v153_v6  ;;  %v693_v55 = vld [vmem:[#allocation8 + $0x64] sm:$0xf0] }
  0xb9   :  { %v215_v43 = vadd.f32 0.4994258, %v214_v42  ;;  %v204_v53 = vadd.f32 0.18741608, %v203_v49  ;;  %v190_v61 = vor.u32 1.1754944e-38, %v189_v54 }
  0xba   :  { %vm188_vm4 = vcmp.eq.f32.partialorder %v187_v57, 8.507059e+37  ;;  %v688_v49 = vld [vmem:[#allocation8 + $0x44] sm:$0xf]  ;;  %v646_v54 = vld [vmem:[#allocation8 + $0x48] sm:$0xf] }
  0xbb   :  { %v216_v46 = vmul.f32 %v215_v43, %v196_v19  ;;  %v205_v60 = vmul.f32 %v204_v53, %v196_v19  ;;  %v643_v53 = vor.u32 %v688_v49, %v640_v50 }
  0xbd   :  { %v217_v47 = vadd.f32 1.0, %v216_v46  ;;  %v711_v48 = vpop.eup %710  ;;  %v206_v7 = vadd.f32 1.1283791, %v205_v60  ;;  %v638_v46 = vld [vmem:[#allocation8 + $0x40] sm:$0xf]  ;;  %452 = vmatpush.bf16.msra.mxu2 %v643_v53 }
  0xbe   :  { %v179_v51 = vmul.f32 %v711_v48, %v177_v40  ;;  %vm184_vm1 = vweird.f32 %v711_v48  ;;  %v680_v60 = vld [vmem:[#allocation8 + $0x4] sm:$0xf] }
  0xbf   :  { %712 = vrcp.f32 %v217_v47  ;;  %vm185_vm3 = vmor %vm183_vm2, %vm184_vm1  ;;  %v229_v4 = vand.u32 2147483648, %v217_v47  ;;  %v227_v9 = vand.u32 2147483647, %v217_v47  ;;  %vm223_vm6 = vweird.f32 %v217_v47 }
  0xc0   :  { %v180_v52 = vsub.f32 1.0, %v179_v51  ;;  %v207_v6 = vmul.f32 %v206_v7, %v925_v14  ;;  %714 = vrcp.f32 %v856_v26 }
  0xc1   :  { %v230_v16 = vor.u32 1.1754944e-38, %v229_v4  ;;  %vm228_vm8 = vcmp.eq.f32.partialorder %v227_v9, 8.507059e+37 }
  0xc2   :  { %v181_v56 = vmul.f32 %v711_v48, %v180_v52 }
  0xc4   :  { %v182_v59 = vadd.f32 %v711_v48, %v181_v56  ;;  %v606_v56 = vld [vmem:[#allocation8] sm:$0xf] }
  0xc5   :  { %v713_v58 = vpop.eup %712 }
  0xc6   :  { %v219_v62 = vmul.f32 %v713_v58, %v217_v47  ;;  %v186_v0 = vsel %vm185_vm3, %v711_v48, %v182_v59  ;;  %vm224_vm5 = vweird.f32 %v713_v58  ;;  %v715_v27 = vpop.eup %714  ;;  %v651_v47 = vor.u32 %v689_v44, %v648_v45  ;;  %v692_v48 = vld [vmem:[#allocation8 + $0x5c] sm:$0xf0] }
  0xc7   :  { %v191_v1 = vsel %vm188_vm4, %v190_v61, %v186_v0  ;;  %vm225_vm7 = vmor %vm223_vm6, %vm224_vm5  ;;  %v246_v14 = vmul.f32 32.0, %v715_v27  ;;  %vm250_vm9 = vweird.f32 %v715_v27  ;;  %v639_v52 = vor.u32 %v692_v48, %v638_v46  ;;  %v684_v59 = vld [vmem:[#allocation8 + $0x1c] sm:$0xf0]  ;;  %v608_v61 = vld [vmem:[#allocation8 + $0x20] sm:$0xf0] }
  0xc8   :  { %v220_v2 = vsub.f32 1.0, %v219_v62  ;;  %v192_v3 = vmul.f32 %v191_v1, %v167_v63  ;;  %480 = vmatpush.bf16.msrb.mxu0 %v651_v47  ;;  %v607_v62 = vor.u32 %v684_v59, %v606_v56  ;;  %v611_v63 = vor.u32 %v680_v60, %v608_v61  ;;  %v614_v0 = vld [vmem:[#allocation8 + $0x8] sm:$0xf] }
  0xc9   :  { %v247_v28 = vsub.f32 1.0, %v246_v14  ;;  %438 = vmatpush.bf16.msra.mxu1 %v639_v52  ;;  %v685_v1 = vld [vmem:[#allocation8 + $0x24] sm:$0xf0] }
  0xca   :  { %v221_v8 = vmul.f32 %v713_v58, %v220_v2  ;;  %v598_v10 = vclamps-f32 %v192_v3, 1.0  ;;  %v681_v2 = vld [vmem:[#allocation8 + $0xc] sm:$0xf]  ;;  %v615_v7 = vor.u32 %v685_v1, %v614_v0  ;;  %453 = vmatpush.bf16.msra.mxu2 %v611_v63 }
  0xcb   :  { %v248_v29 = vmul.f32 %v715_v27, %v247_v28  ;;  %v682_v28 = vld [vmem:[#allocation8 + $0x14] sm:$0xf] }
  0xcc   :  { %v222_v12 = vadd.f32 %v713_v58, %v221_v8  ;;  %v235_v15 = vadd.f32 1.0, %v598_v10  ;;  %v616_v8 = vld [vmem:[#allocation8 + $0x28] sm:$0xf0] }
  0xcd   :  { %v249_v30 = vadd.f32 %v715_v27, %v248_v29  ;;  %v619_v10 = vor.u32 %v681_v2, %v616_v8  ;;  %439 = vmatpush.bf16.msra.mxu1 %v607_v62  ;;  %v624_v29 = vld [vmem:[#allocation8 + $0x30] sm:$0xf0] }
  0xce   :  { %v226_v17 = vsel %vm225_vm7, %v713_v58, %v222_v12  ;;  %v237_v18 = vmul.f32 %v235_v15, %v151_v13  ;;  %v647_v58 = vor.u32 %v693_v55, %v646_v54  ;;  %v690_v15 = vld [vmem:[#allocation8 + $0x54] sm:$0xf] }
  0xcf   :  { %v231_v19 = vsel %vm228_vm8, %v230_v16, %v226_v17  ;;  %v251_v31 = vsel %vm250_vm9, %v715_v27, %v249_v30  ;;  %481 = vmatpush.bf16.msrb.mxu0 %v619_v10  ;;  %v656_v16 = vld [vmem:[#allocation8 + $0x70] sm:$0xf0]  ;;  %v630_v30 = vld [vmem:[#allocation8 + $0x18] sm:$0xf] }
  0xd0   :  { %v232_v20 = vmul.f32 %v231_v19, %v207_v6  ;;  %v239_v21 = vsel %vm133_vm0, %v237_v18, 0.0  ;;  %466 = vmatpush.bf16.msra.mxu3 %v647_v58  ;;  %v662_v6 = vld [vmem:[#allocation8 + $0x58] sm:$0xf] }
  0xd1   :  { %240 = vadd.xlane.f32.xlu0 %v239_v21  ;;  %v695_v19 = vld [vmem:[#allocation8 + $0x74] sm:$0xf0] }
  0xd2   :  { %v599_v22 = vclamps-f32 %v232_v20, 1.0  ;;  %v654_v20 = vld [vmem:[#allocation8 + $0x50] sm:$0xf] }
  0xd4   :  { %v236_v24 = vadd.f32 1.0, %v599_v22  ;;  %467 = vmatpush.bf16.msra.mxu3 %v615_v7  ;;  %v708_v22 = vld [vmem:[%s978_s3] ss:$0 sm:$0xff] }
  0xd6   :  { %v238_v25 = vmul.f32 %v236_v24, %v152_v23  ;;  %v663_v23 = vor.u32 %v695_v19, %v662_v6  ;;  %v694_v24 = vld [vmem:[#allocation8 + $0x6c] sm:$0xf0] }
  0xd7   :  { %v655_v14 = vor.u32 %v694_v24, %v654_v20 }
  0xd8   :  { %v242_v5 = vsel %vm133_vm0, %v238_v25, 0.0  ;;  %522 = vmatpush.bf16.msrb.mxu3 %v663_v23 }
  0xd9   :  { %243 = vadd.xlane.f32.xlu0 %v242_v5  ;;  %v664_v5 = vld [vmem:[#allocation8 + $0x78] sm:$0xf0]  ;;  %494 = vmatpush.bf16.msrb.mxu1 %v655_v14 }
 0x144   :  { %v241_v32 = vpop.xlane.xlu0 %240 }
 0x145   :  { %v252_v33 = vmul.f32 %v251_v31, %v241_v32  ;;  %v627_v32 = vor.u32 %v682_v28, %v624_v29 }
 0x147   :  { %v934_v34 = vsub.f32 %v237_v18, %v252_v33  ;;  %v659_v18 = vor.u32 %v690_v15, %v656_v16  ;;  %v687_v33 = vld [vmem:[#allocation8 + $0x34] sm:$0xf0] }
 0x149   :  { %v256_v11 = vmul.f32 %v934_v34, %v934_v34  ;;  %508 = vmatpush.bf16.msrb.mxu2 %v659_v18 }
 0x14b   :  { %v258_v35 = vsel %vm133_vm0, %v256_v11, 0.0  ;;  %v622_v11 = vld [vmem:[#allocation8 + $0x10] sm:$0xf] }
 0x14c   :  { %259 = vadd.xlane.f32.xlu1 %v258_v35  ;;  %v244_v36 = vpop.xlane.xlu0 %243 }
 0x14d   :  { %v253_v37 = vmul.f32 %v251_v31, %v244_v36  ;;  %509 = vmatpush.bf16.msrb.mxu2 %v627_v32 }
 0x14f   :  { %v939_v38 = vsub.f32 %v238_v25, %v253_v37  ;;  %v691_v25 = vld [vmem:[#allocation8 + $0x5c] sm:$0xf]  ;;  %v631_v37 = vor.u32 %v687_v33, %v630_v30 }
 0x151   :  { %v257_v39 = vmul.f32 %v939_v38, %v939_v38  ;;  %523 = vmatpush.bf16.msrb.mxu3 %v631_v37 }
 0x153   :  { %v261_v40 = vsel %vm133_vm0, %v257_v39, 0.0  ;;  %v686_v39 = vld [vmem:[#allocation8 + $0x2c] sm:$0xf0] }
 0x154   :  { %262 = vadd.xlane.f32.xlu1 %v261_v40  ;;  %v683_v40 = vld [vmem:[#allocation8 + $0x1c] sm:$0xf]  ;;  %v623_v44 = vor.u32 %v686_v39, %v622_v11 }
 0x156   :  { %495 = vmatpush.bf16.msrb.mxu1 %v623_v44 }
 0x1bf   :  { %v260_v41 = vpop.xlane.xlu1 %259 }
 0x1c0   :  { %v264_v42 = vmul.f32 %v260_v41, %v251_v31  ;;  %v632_v41 = vld [vmem:[#allocation8 + $0x38] sm:$0xf0] }
 0x1c1   :  { %v635_v45 = vor.u32 %v683_v40, %v632_v41 }
 0x1c2   :  { %v944_v43 = vadd.f32 1e-12, %v264_v42  ;;  %v709_v42 = vld [vmem:[%s979_s4] ss:$0 sm:$0xff]  ;;  %s857_s4 = smov [#allocation11]  }
 0x1c3   :  { %s568_s25 = sshll.u32 %s857_s4, 4  ;;  %s569_s25 = int_to_ptr.vmem [resolvable:$true] %s568_s25 }
 0x1c4   :  { %716 = vrsqrt.f32 %v944_v43  ;;  %vm274_vm11 = vweird.f32 %v944_v43 }
 0x1c7   :  { %v263_v51 = vpop.xlane.xlu1 %262 }
 0x1c8   :  { %v265_v57 = vmul.f32 %v263_v51, %v251_v31  ;;  %v667_v31 = vor.u32 %v691_v25, %v664_v5 }
 0x1ca   :  { %v717_v3 = vpop.eup %716  ;;  %v947_v4 = vadd.f32 1e-12, %v265_v57  ;;  %536 = vmatpush.bf16.msra.mxu0 %v667_v31 }
 0x1cb   :  { %v269_v9 = vmul.f32 %v717_v3, %v944_v43  ;;  %vm275_vm10 = vweird.f32 %v717_v3 }
 0x1cc   :  { %718 = vrsqrt.f32 %v947_v4  ;;  %vm276_vm12 = vmor %vm274_vm11, %vm275_vm10  ;;  %vm284_vm15 = vweird.f32 %v947_v4 }
 0x1cd   :  { %v270_v12 = vmul.f32 %v717_v3, %v269_v9 }
 0x1ce   :  { %537 = vmatpush.bf16.msra.mxu0 %v635_v45 }
 0x1cf   :  { %v271_v13 = vmul.f32 0.5, %v270_v12 }
 0x1d1   :  { %v272_v17 = vsub.f32 1.5, %v271_v13 }
 0x1d2   :  { %v719_v21 = vpop.eup %718 }
 0x1d3   :  { %v273_v26 = vmul.f32 %v717_v3, %v272_v17  ;;  %v279_v27 = vmul.f32 %v719_v21, %v947_v4  ;;  %vm285_vm13 = vweird.f32 %v719_v21 }
 0x1d4   :  { %vm286_vm1 = vmor %vm284_vm15, %vm285_vm13 }
 0x1d5   :  { %v277_v35 = vsel %vm276_vm12, %v717_v3, %v273_v26  ;;  %v280_v36 = vmul.f32 %v719_v21, %v279_v27 }
 0x1d6   :  { %v288_v43 = vmul.f32 %v277_v35, %v934_v34 }
 0x1d7   :  { %v281_v46 = vmul.f32 0.5, %v280_v36 }
 0x1d8   :  { %v294_v47 = vmul.f32 %v708_v22, %v288_v43 }
 0x1d9   :  { %v282_v48 = vsub.f32 1.5, %v281_v46 }
 0x1da   :  { %v300_v49 = vadd.f32 %v709_v42, %v294_v47 }
 0x1db   :  { %v283_v50 = vmul.f32 %v719_v21, %v282_v48 }
 0x1dc   :  { %v302_v51 = vpack.c.bf16 %v300_v49, %v300_v49 }
 0x1dd   :  { %v287_v52 = vsel %vm286_vm1, %v719_v21, %v283_v50 }
 0x1de   :  { %305 = vst.msk [vmem:[#allocation2] sm:$0xf] %vm304_vm14, %v302_v51  ;;  %v289_v34 = vmul.f32 %v287_v52, %v939_v38  ;;  %v325_v38 = vld [vmem:[#allocation9] sm:$0xff] }
 0x1df   :  { %v327_v57 = vperm.slane %v325_v38, 0  ;;  %v330_v58 = vperm.slane %v325_v38, 3  ;;  %v328_v63 = vperm.slane %v325_v38, 1  ;;  %v329_v0 = vperm.slane %v325_v38, 2 }
 0x1e0   :  { %v295_v53 = vmul.f32 %v708_v22, %v289_v34  ;;  %v331_v12 = vperm.slane %v325_v38, 4  ;;  %v334_v15 = vperm.slane %v325_v38, 7  ;;  %v332_v22 = vperm.slane %v325_v38, 5 }
 0x1e1   :  { %v333_v23 = vperm.slane %v325_v38, 6 }
 0x1e2   :  { %v301_v54 = vadd.f32 %v709_v42, %v295_v53 }
 0x1e4   :  { %v303_v55 = vpack.c.bf16 %v301_v54, %v301_v54 }
 0x1e6   :  { %306 = vst.msk [vmem:[#allocation2 + $0x4] sm:$0xf] %vm304_vm14, %v303_v55 }
 0x1ed   :  { %v679_v56 = vld [vmem:[#allocation2] sm:$0xff] }
 0x1ee   :  { %668 = vmatmul.msk.bf16.vlgmr.msra.gmra.mxu1 %vm133_vm0, %v679_v56  ;;  %669 = vmatmul.msk.bf16.vlgmr.msra.gmra.mxu2 %vm133_vm0, %v679_v56 }
 0x1ef   :  { %670 = vmatmul.msk.bf16.vlgmr.msra.gmra.mxu3 %vm133_vm0, %v679_v56  ;;  %671 = vmatmul.msk.bf16.vlgmr.msrb.gmra.mxu0 %vm133_vm0, %v679_v56 }
 0x1fe   :  { %672 = vmatmul.msk.bf16.vlgmr.msrb.gmra.mxu1 %vm133_vm0, %v679_v56  ;;  %673 = vmatmul.msk.bf16.vlgmr.msrb.gmra.mxu2 %vm133_vm0, %v679_v56 }
 0x1ff   :  { %674 = vmatmul.msk.bf16.vlgmr.msrb.gmra.mxu3 %vm133_vm0, %v679_v56  ;;  %675 = vmatmul.msk.bf16.vlgmr.msra.gmra.mxu0 %vm133_vm0, %v679_v56 }
 0x26b   :  { %v441_v59 = vpop.f32.mrf.mxu1 }
 0x26c   :  { %v442_v60 = vadd.f32 %v441_v59, %v327_v57  ;;  %v483_v61 = vpop.f32.mrf.mxu0 }
 0x26d   :  { %v484_v62 = vadd.f32 %v483_v61, %v330_v58 }
 0x26e   :  { %544 = vst [vmem:[#allocation11] sm:$0xff] %v442_v60 }
 0x26f   :  { %547 = vst [vmem:[#allocation11 + $0x18] sm:$0xff] %v484_v62 }
 0x271   :  { %v455_v1 = vpop.f32.mrf.mxu2 }
 0x272   :  { %v456_v2 = vadd.f32 %v455_v1, %v328_v63  ;;  %v469_v3 = vpop.f32.mrf.mxu3 }
 0x273   :  { %v470_v4 = vadd.f32 %v469_v3, %v329_v0  ;;  %v443_v7 = vpop.f32.mrf.mxu1 }
 0x274   :  { %545 = vst [vmem:[#allocation11 + $0x8] sm:$0xff] %v456_v2  ;;  %v444_v8 = vadd.f32 %v443_v7, %v327_v57  ;;  %v485_v9 = vpop.f32.mrf.mxu0 }
 0x275   :  { %546 = vst [vmem:[#allocation11 + $0x10] sm:$0xff] %v470_v4  ;;  %v486_v10 = vadd.f32 %v485_v9, %v330_v58 }
 0x276   :  { %552 = vst [vmem:[#allocation11 + $0x40] sm:$0xff] %v444_v8 }
 0x277   :  { %555 = vst [vmem:[#allocation11 + $0x58] sm:$0xff] %v486_v10 }
 0x279   :  { %v457_v13 = vpop.f32.mrf.mxu2 }
 0x27a   :  { %v458_v16 = vadd.f32 %v457_v13, %v328_v63  ;;  %v471_v6 = vpop.f32.mrf.mxu3 }
 0x27b   :  { %v472_v17 = vadd.f32 %v471_v6, %v329_v0  ;;  %v497_v18 = vpop.f32.mrf.mxu1 }
 0x27c   :  { %553 = vst [vmem:[#allocation11 + $0x48] sm:$0xff] %v458_v16  ;;  %v498_v19 = vadd.f32 %v497_v18, %v331_v12  ;;  %v539_v20 = vpop.f32.mrf.mxu0 }
 0x27d   :  { %554 = vst [vmem:[#allocation11 + $0x50] sm:$0xff] %v472_v17  ;;  %v540_v21 = vadd.f32 %v539_v20, %v334_v15 }
 0x27e   :  { %548 = vst [vmem:[#allocation11 + $0x20] sm:$0xff] %v498_v19 }
 0x27f   :  { %551 = vst [vmem:[#allocation11 + $0x38] sm:$0xff] %v540_v21 }
 0x281   :  { %v511_v24 = vpop.f32.mrf.mxu2 }
 0x282   :  { %v512_v25 = vadd.f32 %v511_v24, %v332_v22  ;;  %v525_v5 = vpop.f32.mrf.mxu3 }
 0x283   :  { %v526_v26 = vadd.f32 %v525_v5, %v333_v23  ;;  %v499_v27 = vpop.f32.mrf.mxu1 }
 0x284   :  { %549 = vst [vmem:[#allocation11 + $0x28] sm:$0xff] %v512_v25  ;;  %v500_v14 = vadd.f32 %v499_v27, %v331_v12  ;;  %v541_v28 = vpop.f32.mrf.mxu0 }
 0x285   :  { %550 = vst [vmem:[#allocation11 + $0x30] sm:$0xff] %v526_v26  ;;  %v542_v29 = vadd.f32 %v541_v28, %v334_v15 }
 0x286   :  { %556 = vst [vmem:[#allocation11 + $0x60] sm:$0xff] %v500_v14 }
 0x287   :  { %559 = vst [vmem:[#allocation11 + $0x78] sm:$0xff] %v542_v29 }
 0x289   :  { %v513_v30 = vpop.f32.mrf.mxu2 }
 0x28a   :  { %v514_v31 = vadd.f32 %v513_v30, %v332_v22  ;;  %v527_v32 = vpop.f32.mrf.mxu3 }
 0x28b   :  { %v528_v33 = vadd.f32 %v527_v32, %v333_v23 }
 0x28c   :  { %557 = vst [vmem:[#allocation11 + $0x68] sm:$0xff] %v514_v31 }
 0x28d   :  { %558 = vst [vmem:[#allocation11 + $0x70] sm:$0xff] %v528_v33 }
 0x28e   :  { %576 = dma.vmem_to_hbm [thread:$0]  %s569_s25, 2048, %s571_s28, [#allocation5], %s858_s29, %s858_s29, %s849_s9  }
 0x28f   :  { %846 = dma.done.wait [#allocation5], 2048  }
 0x290   :  { %847 = vsyncadd [#allocation5], 4294965248 }
 0x291   :  { %581 = vsyncpa [#allocation4], 1 }
 0x292   :  { %582 = vsyncpa [#allocation7], 1 }
 0x293   :  { %583 = vsyncpa [#allocation10], 1 }
 0x294   :  { %584 = vsyncpa [#allocation5], 1 }

</bundles_post_ra>
